<compile_context>
chip_gen: v6e
topology: v6e:2x2x1
jax: 0.10.0
libtpu: 0.0.40
codegen_flags: <defaults>
</compile_context>

<pallas_src>
import functools

import jax
import jax.numpy as jnp
from jax.experimental import pallas as pl
from jax.experimental.pallas import tpu as pltpu

LANE = 128


def _round_up(x, m):
    return (x + m - 1) // m * m


def _pick_tiles(n):
    """Node padding + (row tile tm, reduction tile tk) for kernel 1.

    Small graphs: one block, grid (1,1) -- any multi-step grid would be pure pipeline
    overhead (~0.35us/step) for sub-MiB problems.  (On v7x this forgoes 2-TC sharding,
    which is irrelevant at these sizes.)
    Large graphs: tm=512, tk up to 2048 so each int8 A_hat tile DMA (~1 MiB) amortizes
    the fixed per-step cost; everything stays well under 32 MiB scoped VMEM on v5e/v6e/v7x.
    """
    if n <= 2048:
        n_pad = max(LANE, _round_up(n, LANE))
        return n_pad, n_pad, n_pad
    n_pad = _round_up(n, 512)
    if n_pad % 2048 == 0:
        tk = 2048
    elif n_pad % 1024 == 0:
        tk = 1024
    else:
        tk = 512
    return n_pad, 512, tk


# ----------------------------------------------------------------------------
# Kernel 1:  z = dinv * ( relu(dinv * (A_hat @ (dinv * X W1)) + b1) @ w2 )
# ----------------------------------------------------------------------------
def _gcn_layer1_kernel(a_ref, xw1_ref, dinv_ref, b1_ref, w2_ref, z_ref, acc_ref, *, tk):
    k = pl.program_id(1)

    @pl.when(k == 0)
    def _init():
        acc_ref[...] = jnp.zeros_like(acc_ref)

    # int8 A_hat tile -> bf16 on the VPU (0/1/2 values are exact), MXU f32-accumulate.
    # xw1s stays VMEM-resident (constant block index) and is sliced per reduction step.
    off = pl.multiple_of(k * tk, tk)
    a_bf16 = a_ref[...].astype(jnp.bfloat16)
    acc_ref[...] += jnp.dot(a_bf16, xw1_ref[pl.ds(off, tk), :],
                            preferred_element_type=jnp.float32)

    @pl.when(k == pl.num_programs(1) - 1)
    def _finalize():
        dinv = dinv_ref[...]                                      # [tm, 1] f32
        h = jnp.maximum(dinv * acc_ref[...] + b1_ref[...], 0.0)   # layer-1 out (f32, v5e-safe)
        # Layer-2 projection folded in (exact by associativity): z = dinv * (h @ w2).
        # VPU broadcast-multiply + XLU lane reduce in the otherwise-idle finalize step;
        # kills the entire N x 128 f32 h round trip through HBM.
        z_ref[...] = dinv * jnp.sum(h * w2_ref[...], axis=1, keepdims=True)


def _gcn_layer1(a_hat_i8, xw1s, dinv_col, b1, w2_row, *, tm, tk):
    n_pad, hp = xw1s.shape
    grid = (n_pad // tm, n_pad // tk)
    return pl.pallas_call(
        functools.partial(_gcn_layer1_kernel, tk=tk),
        out_shape=jax.ShapeDtypeStruct((n_pad, 1), jnp.float32),
        grid_spec=pltpu.PrefetchScalarGridSpec(
            num_scalar_prefetch=0,
            grid=grid,
            in_specs=[
                pl.BlockSpec((tm, tk), lambda i, k: (i, k)),     # A_hat tile (int8)
                # dinv*(X@W1) bf16, VMEM-resident (constant index). NOTE(v7x, huge N):
                # if this ever crowds the 64 MiB part, stream it as (tk, hp) blocks instead.
                pl.BlockSpec((n_pad, hp), lambda i, k: (0, 0)),
                pl.BlockSpec((tm, 1), lambda i, k: (i, 0)),      # dinv rows
                pl.BlockSpec((1, hp), lambda i, k: (0, 0)),      # b1
                pl.BlockSpec((1, hp), lambda i, k: (0, 0)),      # w2 as a lane row
            ],
            out_specs=pl.BlockSpec((tm, 1), lambda i, k: (i, 0)),
            scratch_shapes=[pltpu.VMEM((tm, hp), jnp.float32)],
        ),
        compiler_params=pltpu.CompilerParams(
            dimension_semantics=("parallel", "arbitrary"),       # row axis shards v7x megacore
            vmem_limit_bytes=32 * 1024 * 1024,
        ),
        cost_estimate=pl.CostEstimate(
            flops=2 * n_pad * n_pad * hp,
            transcendentals=0,
            bytes_accessed=n_pad * n_pad + n_pad * hp * 2 + n_pad * 8,
        ),
    )(a_hat_i8, xw1s, dinv_col, b1, w2_row)


# ----------------------------------------------------------------------------
# Kernel 2 (tiny, O(G*N)):  pred = dinv_big * (A_big @ z) + b2
# ----------------------------------------------------------------------------
def _readout_kernel(a_big_ref, z_ref, dinv_ref, b2_ref, out_ref, acc_ref):
    k = pl.program_id(0)

    @pl.when(k == 0)
    def _init():
        acc_ref[...] = jnp.zeros_like(acc_ref)

    # VPU broadcast-multiply + XLU lane reduce (avoids a wasteful 1-wide MXU matmul).
    acc_ref[...] += jnp.sum(a_big_ref[...] * z_ref[...], axis=1, keepdims=True)

    @pl.when(k == pl.num_programs(0) - 1)
    def _finalize():
        out_ref[...] = dinv_ref[...] * acc_ref[...] + b2_ref[...]


def _readout(a_big, z_row, dinv_big, b2, *, tk):
    g_pad, n_pad = a_big.shape
    return pl.pallas_call(
        _readout_kernel,
        out_shape=jax.ShapeDtypeStruct((g_pad, 1), jnp.float32),
        grid_spec=pltpu.PrefetchScalarGridSpec(
            num_scalar_prefetch=0,
            grid=(n_pad // tk,),
            in_specs=[
                pl.BlockSpec((g_pad, tk), lambda k: (0, k)),     # A_hat rows at big nodes (f32)
                pl.BlockSpec((1, tk), lambda k: (0, k)),         # z as a lane row
                pl.BlockSpec((g_pad, 1), lambda k: (0, 0)),      # dinv at big nodes
                pl.BlockSpec((1, 1), lambda k: (0, 0)),          # b2
            ],
            out_specs=pl.BlockSpec((g_pad, 1), lambda k: (0, 0)),
            scratch_shapes=[pltpu.VMEM((g_pad, 1), jnp.float32)],
        ),
        compiler_params=pltpu.CompilerParams(
            dimension_semantics=("arbitrary",),
            vmem_limit_bytes=32 * 1024 * 1024,
        ),
    )(a_big, z_row, dinv_big, b2)


# ----------------------------------------------------------------------------
# Forward (plain-JAX glue around the two Pallas kernels)
# ----------------------------------------------------------------------------
def gene_expression_gnn_forward(params, x, edge_index, batch, num_graphs):
    n, f_in = x.shape
    hidden = params["w1"].shape[1]
    hp = _round_up(hidden, LANE)
    n_pad, tm, tk = _pick_tiles(n)

    # dense A_hat = A + I built directly in int8 (no f32 N^2 intermediate / cast pass);
    # matches the reference's set-then-add-eye (dedup) semantics, values in {0,1,2}.
    src, dst = edge_index[0], edge_index[1]
    a_hat_i8 = jnp.zeros((n_pad, n_pad), jnp.int8)
    a_hat_i8 = a_hat_i8.at[dst, src].set(1)                 # message src -> dst
    diag = jnp.arange(n)
    a_hat_i8 = a_hat_i8.at[diag, diag].add(1)               # self loops on real nodes only
    deg = jnp.sum(a_hat_i8, axis=1, dtype=jnp.int32).astype(jnp.float32)
    dinv = jnp.where(deg > 0, jax.lax.rsqrt(deg), 0.0)      # [n_pad]; 0 on padded rows

    # lane-pad parameters to 128 channels
    w1 = jnp.zeros((f_in, hp), jnp.float32).at[:, :hidden].set(params["w1"])
    b1 = jnp.zeros((1, hp), jnp.float32).at[:, :hidden].set(params["b1"].reshape(1, -1))
    w2_row = jnp.zeros((1, hp), jnp.float32).at[:, :hidden].set(params["w2"].reshape(1, -1))
    b2 = params["b2"].reshape(1, 1).astype(jnp.float32)

    # xw1s[j,:] = dinv[j] * (X @ W1)[j,:]  (column factor of adj_norm folded in), bf16 for MXU
    xw1 = jnp.zeros((n_pad, hp), jnp.float32).at[:n].set(x @ w1)
    xw1s = (dinv[:, None] * xw1).astype(jnp.bfloat16)
    dinv_col = dinv[:, None]                                # [n_pad, 1] f32

    z = _gcn_layer1(a_hat_i8, xw1s, dinv_col, b1, w2_row, tm=tm, tk=tk)   # [n_pad, 1] f32
    z_row = z.reshape(1, n_pad)                             # lane-dense row for kernel 2

    # big-node indices: last node of each graph
    counts = jnp.bincount(batch, length=num_graphs)
    big_idx = (jnp.cumsum(counts) - 1).astype(jnp.int32)    # [G]
    g_pad = max(8, _round_up(num_graphs, 8))
    big_idx_pad = jnp.zeros((g_pad,), jnp.int32).at[:num_graphs].set(big_idx)
    a_big = a_hat_i8[big_idx_pad].astype(jnp.float32)       # [g_pad, n_pad]  O(G*N), tiny
    dinv_big = jnp.zeros((g_pad, 1), jnp.float32).at[:num_graphs, 0].set(dinv[big_idx])

    out_pad = _readout(a_big, z_row, dinv_big, b2, tk=tk)   # [g_pad, 1]
    return jnp.squeeze(out_pad[:num_graphs])


# ----------------------------------------------------------------------------
# Pure-jnp f32 reference (mirrors the PyTorch module semantics)
# ----------------------------------------------------------------------------
def reference_forward(params, x, edge_index, batch, num_graphs):
    n = x.shape[0]
    src, dst = edge_index[0], edge_index[1]
    a = jnp.zeros((n, n), jnp.float32).at[dst, src].set(1.0) + jnp.eye(n, dtype=jnp.float32)
    deg = jnp.sum(a, axis=1)
    dinv = jnp.where(deg > 0, 1.0 / jnp.sqrt(deg), 0.0)
    adjn = dinv[:, None] * a * dinv[None, :]
    h = jnp.maximum(adjn @ (x @ params["w1"]) + params["b1"], 0.0)
    out = adjn @ (h @ params["w2"]) + params["b2"]
    idx = jnp.cumsum(jnp.bincount(batch, length=num_graphs)) - 1
    return jnp.squeeze(out[idx])


def init_params(key, in_channels, hidden_channels):
    k1, k2 = jax.random.split(key)
    s1 = (6.0 / (in_channels + hidden_channels)) ** 0.5
    s2 = (6.0 / (hidden_channels + 1)) ** 0.5
    return {
        "w1": jax.random.uniform(k1, (in_channels, hidden_channels), jnp.float32, -s1, s1),
        "b1": jnp.zeros((1, hidden_channels), jnp.float32),
        "w2": jax.random.uniform(k2, (hidden_channels, 1), jnp.float32, -s2, s2),
        "b2": jnp.zeros((1, 1), jnp.float32),
    }


if __name__ == "__main__":
    key = jax.random.PRNGKey(0)

    in_channels = 8
    hidden_channels = 64            # matches the PyTorch module
    num_graphs = 4
    nodes_per_graph = 40
    N = num_graphs * nodes_per_graph        # 160 nodes -> padded to 256, kernel-1 grid (1, 1)

    kx, kp = jax.random.split(key)
    x = jax.random.normal(kx, (N, in_channels), jnp.float32)
    batch = jnp.repeat(jnp.arange(num_graphs, dtype=jnp.int32), nodes_per_graph)

    # undirected chain inside each graph (both edge directions stored)
    src_list, dst_list = [], []
    for g in range(num_graphs):
        base = g * nodes_per_graph
        for i in range(nodes_per_graph - 1):
            src_list += [base + i, base + i + 1]
            dst_list += [base + i + 1, base + i]
    edge_index = jnp.array([src_list, dst_list], dtype=jnp.int32)      # [2, E]

    params = init_params(kp, in_channels, hidden_channels)

    fwd = jax.jit(functools.partial(gene_expression_gnn_forward, num_graphs=num_graphs))
    pred = fwd(params, x, edge_index, batch)
    jax.block_until_ready(pred)

    ref = reference_forward(params, x, edge_index, batch, num_graphs)
    assert pred.shape == (num_graphs,)
    # bf16 operand streaming (f32 accumulation) vs pure-f32 reference -> loose-ish tolerance
    assert jnp.allclose(pred, ref, atol=3e-2, rtol=3e-2), (
        f"max abs err = {float(jnp.max(jnp.abs(pred - ref))):.3e}")

    print("KERNEL_OK")
</pallas_src>

<mosaic_0001>
module attributes {stable_mosaic.version = 11 : i64} {
  func.func private @main(%arg0: i32) attributes {dimension_semantics = [#tpu.dimension_semantics<core_parallel>], iteration_bounds = array<i64: 2>, tpu.core_type = #tpu.core_type<sc_scalar_subcore>, window_params = []} {
    return
  }
}

module attributes {stable_mosaic.version = 11 : i64} {
  func.func private @main(%arg0: i32) attributes {dimension_semantics = [#tpu.dimension_semantics<core_parallel>], iteration_bounds = array<i64: 2>, tpu.core_type = #tpu.core_type<sc_scalar_subcore>, window_params = []} {
    return
  }
}

module attributes {stable_mosaic.version = 11 : i64} {
  func.func @_gcn_layer1_kernel(%arg0: i32, %arg1: i32, %arg2: memref<256x256xi8, #tpu.memory_space<vmem>>, %arg3: memref<256x128xbf16, #tpu.memory_space<vmem>>, %arg4: memref<256x1xf32, #tpu.memory_space<vmem>>, %arg5: memref<1x128xf32, #tpu.memory_space<vmem>>, %arg6: memref<1x128xf32, #tpu.memory_space<vmem>>, %arg7: memref<256x1xf32, #tpu.memory_space<vmem>>, %arg8: memref<256x128xf32, #tpu.memory_space<vmem>>) attributes {dimension_semantics = [#tpu.dimension_semantics<parallel>, #tpu.dimension_semantics<arbitrary>], iteration_bounds = array<i64: 1, 1>, scalar_prefetch = 0 : i64, scratch_operands = 1 : i64, tpu.core_type = #tpu.core_type<tc>, window_params = [{transform_indices = @transform_0, window_bounds = array<i64: 256, 256>}, {pipeline_mode = #tpu.pipeline_mode<synchronous>, transform_indices = @transform_1, window_bounds = array<i64: 256, 128>}, {transform_indices = @transform_2, window_bounds = array<i64: 256, 1>}, {pipeline_mode = #tpu.pipeline_mode<synchronous>, transform_indices = @transform_3, window_bounds = array<i64: 1, 128>}, {pipeline_mode = #tpu.pipeline_mode<synchronous>, transform_indices = @transform_4, window_bounds = array<i64: 1, 128>}, {transform_indices = @transform_5, window_bounds = array<i64: 256, 1>}]} {
    %c0_i32 = arith.constant 0 : i32
    %0 = arith.cmpi eq, %arg1, %c0_i32 : i32
    %1 = arith.extui %0 : i1 to i32
    %c0_i32_0 = arith.constant 0 : i32
    %2 = arith.cmpi ne, %1, %c0_i32_0 : i32
    scf.if %2 {
      %cst_9 = arith.constant 0.000000e+00 : f32
      %16 = vector.broadcast %cst_9 : f32 to vector<256x128xf32>
      %c0_10 = arith.constant 0 : index
      %c0_11 = arith.constant 0 : index
      %17 = vector.load %arg8[%c0_10, %c0_11] : memref<256x128xf32, #tpu.memory_space<vmem>>, vector<256x128xf32>
      tpu.vector_store %arg8[%c0_10, %c0_11], %16 {strides = array<i32>} : memref<256x128xf32, #tpu.memory_space<vmem>>, vector<256x128xf32>,
    } else {
    }
    %c256_i32 = arith.constant 256 : i32
    %3 = arith.muli %arg1, %c256_i32 : i32
    %4 = tpu.assume_multiple %3, 256 : i32
    %c0 = arith.constant 0 : index
    %c0_1 = arith.constant 0 : index
    %5 = vector.load %arg2[%c0, %c0_1] : memref<256x256xi8, #tpu.memory_space<vmem>>, vector<256x256xi8>
    %6 = arith.sitofp %5 : vector<256x256xi8> to vector<256x256xbf16>
    %c0_2 = arith.constant 0 : index
    %c0_3 = arith.constant 0 : index
    %7 = vector.load %arg8[%c0_2, %c0_3] : memref<256x128xf32, #tpu.memory_space<vmem>>, vector<256x128xf32>
    %8 = arith.index_cast %4 : i32 to index
    %c0_4 = arith.constant 0 : index
    %9 = vector.load %arg3[%8, %c0_4] : memref<256x128xbf16, #tpu.memory_space<vmem>>, vector<256x128xbf16>
    %cst = arith.constant dense<0.000000e+00> : vector<256x128xf32>
    %10 = tpu.matmul %6, %9, %cst {dimension_numbers = #tpu.dot_dimension_numbers<[1], [0], [0], [1], [0, 0, 1, 1], [], []>} : vector<256x256xbf16>, vector<256x128xbf16>, vector<256x128xf32> -> vector<256x128xf32>
    %11 = arith.addf %7, %10 : vector<256x128xf32>
    %c0_5 = arith.constant 0 : index
    %c0_6 = arith.constant 0 : index
    %12 = vector.load %arg8[%c0_5, %c0_6] : memref<256x128xf32, #tpu.memory_space<vmem>>, vector<256x128xf32>
    tpu.vector_store %arg8[%c0_5, %c0_6], %11 {strides = array<i32>} : memref<256x128xf32, #tpu.memory_space<vmem>>, vector<256x128xf32>,
    %c0_i32_7 = arith.constant 0 : i32
    %13 = arith.cmpi eq, %arg1, %c0_i32_7 : i32
    %14 = arith.extui %13 : i1 to i32
    %c0_i32_8 = arith.constant 0 : i32
    %15 = arith.cmpi ne, %14, %c0_i32_8 : i32
    scf.if %15 {
      %c0_9 = arith.constant 0 : index
      %c0_10 = arith.constant 0 : index
      %16 = vector.load %arg4[%c0_9, %c0_10] : memref<256x1xf32, #tpu.memory_space<vmem>>, vector<256x1xf32>
      %c0_11 = arith.constant 0 : index
      %c0_12 = arith.constant 0 : index
      %17 = vector.load %arg8[%c0_11, %c0_12] : memref<256x128xf32, #tpu.memory_space<vmem>>, vector<256x128xf32>
      %18 = vector.broadcast %16 : vector<256x1xf32> to vector<256x128xf32>
      %19 = arith.mulf %18, %17 : vector<256x128xf32>
      %c0_13 = arith.constant 0 : index
      %c0_14 = arith.constant 0 : index
      %20 = vector.load %arg5[%c0_13, %c0_14] : memref<1x128xf32, #tpu.memory_space<vmem>>, vector<1x128xf32>
      %21 = vector.broadcast %20 : vector<1x128xf32> to vector<256x128xf32>
      %22 = arith.addf %19, %21 : vector<256x128xf32>
      %cst_15 = arith.constant 0.000000e+00 : f32
      %23 = vector.broadcast %cst_15 : f32 to vector<256x128xf32>
      %24 = arith.maximumf %22, %23 : vector<256x128xf32>
      %c0_16 = arith.constant 0 : index
      %c0_17 = arith.constant 0 : index
      %25 = vector.load %arg6[%c0_16, %c0_17] : memref<1x128xf32, #tpu.memory_space<vmem>>, vector<1x128xf32>
      %26 = vector.broadcast %25 : vector<1x128xf32> to vector<256x128xf32>
      %27 = arith.mulf %24, %26 : vector<256x128xf32>
      %cst_18 = arith.constant dense<0.000000e+00> : vector<256xf32>
      %28 = vector.multi_reduction <add>, %27, %cst_18 [1] : vector<256x128xf32> to vector<256xf32>
      %29 = vector.shape_cast %28 : vector<256xf32> to vector<256x1xf32>
      %30 = arith.mulf %16, %29 : vector<256x1xf32>
      %c0_19 = arith.constant 0 : index
      %c0_20 = arith.constant 0 : index
      %31 = vector.load %arg7[%c0_19, %c0_20] : memref<256x1xf32, #tpu.memory_space<vmem>>, vector<256x1xf32>
      tpu.vector_store %arg7[%c0_19, %c0_20], %30 {strides = array<i32>} : memref<256x1xf32, #tpu.memory_space<vmem>>, vector<256x1xf32>,
    } else {
    }
    return
  }
  func.func @transform_0(%arg0: i32, %arg1: i32) -> (i32, i32) {
    %c0_i32 = arith.constant 0 : i32
    return %arg0, %arg1 : i32, i32
  }
  func.func @transform_1(%arg0: i32, %arg1: i32) -> (i32, i32) {
    %c0_i32 = arith.constant 0 : i32
    %c0_i32_0 = arith.constant 0 : i32
    %c0_i32_1 = arith.constant 0 : i32
    return %c0_i32, %c0_i32_0 : i32, i32
  }
  func.func @transform_2(%arg0: i32, %arg1: i32) -> (i32, i32) {
    %c0_i32 = arith.constant 0 : i32
    %c0_i32_0 = arith.constant 0 : i32
    return %arg0, %c0_i32 : i32, i32
  }
  func.func @transform_3(%arg0: i32, %arg1: i32) -> (i32, i32) {
    %c0_i32 = arith.constant 0 : i32
    %c0_i32_0 = arith.constant 0 : i32
    %c0_i32_1 = arith.constant 0 : i32
    return %c0_i32, %c0_i32_0 : i32, i32
  }
  func.func @transform_4(%arg0: i32, %arg1: i32) -> (i32, i32) {
    %c0_i32 = arith.constant 0 : i32
    %c0_i32_0 = arith.constant 0 : i32
    %c0_i32_1 = arith.constant 0 : i32
    return %c0_i32, %c0_i32_0 : i32, i32
  }
  func.func @transform_5(%arg0: i32, %arg1: i32) -> (i32, i32) {
    %c0_i32 = arith.constant 0 : i32
    %c0_i32_0 = arith.constant 0 : i32
    return %arg0, %c0_i32 : i32, i32
  }
}

module attributes {stable_mosaic.version = 11 : i64} {
  func.func @_readout_kernel(%arg0: i32, %arg1: memref<8x256xf32, #tpu.memory_space<vmem>>, %arg2: memref<1x256xf32, #tpu.memory_space<vmem>>, %arg3: memref<8x1xf32, #tpu.memory_space<vmem>>, %arg4: memref<1x1xf32, #tpu.memory_space<vmem>>, %arg5: memref<8x1xf32, #tpu.memory_space<vmem>>, %arg6: memref<8x1xf32, #tpu.memory_space<vmem>>) attributes {dimension_semantics = [#tpu.dimension_semantics<arbitrary>], iteration_bounds = array<i64: 1>, scalar_prefetch = 0 : i64, scratch_operands = 1 : i64, tpu.core_type = #tpu.core_type<tc>, window_params = [{transform_indices = @transform_0, window_bounds = array<i64: 8, 256>}, {transform_indices = @transform_1, window_bounds = array<i64: 1, 256>}, {pipeline_mode = #tpu.pipeline_mode<synchronous>, transform_indices = @transform_2, window_bounds = array<i64: 8, 1>}, {pipeline_mode = #tpu.pipeline_mode<synchronous>, transform_indices = @transform_3, window_bounds = array<i64: 1, 1>}, {pipeline_mode = #tpu.pipeline_mode<synchronous>, transform_indices = @transform_4, window_bounds = array<i64: 8, 1>}]} {
    %c0_i32 = arith.constant 0 : i32
    %0 = arith.cmpi eq, %arg0, %c0_i32 : i32
    %1 = arith.extui %0 : i1 to i32
    %c0_i32_0 = arith.constant 0 : i32
    %2 = arith.cmpi ne, %1, %c0_i32_0 : i32
    scf.if %2 {
      %cst_10 = arith.constant 0.000000e+00 : f32
      %15 = vector.broadcast %cst_10 : f32 to vector<8x1xf32>
      %c0_11 = arith.constant 0 : index
      %c0_12 = arith.constant 0 : index
      %16 = vector.load %arg6[%c0_11, %c0_12] : memref<8x1xf32, #tpu.memory_space<vmem>>, vector<8x1xf32>
      tpu.vector_store %arg6[%c0_11, %c0_12], %15 {strides = array<i32>} : memref<8x1xf32, #tpu.memory_space<vmem>>, vector<8x1xf32>,
    } else {
    }
    %c0 = arith.constant 0 : index
    %c0_1 = arith.constant 0 : index
    %3 = vector.load %arg6[%c0, %c0_1] : memref<8x1xf32, #tpu.memory_space<vmem>>, vector<8x1xf32>
    %c0_2 = arith.constant 0 : index
    %c0_3 = arith.constant 0 : index
    %4 = vector.load %arg1[%c0_2, %c0_3] : memref<8x256xf32, #tpu.memory_space<vmem>>, vector<8x256xf32>
    %c0_4 = arith.constant 0 : index
    %c0_5 = arith.constant 0 : index
    %5 = vector.load %arg2[%c0_4, %c0_5] : memref<1x256xf32, #tpu.memory_space<vmem>>, vector<1x256xf32>
    %6 = vector.broadcast %5 : vector<1x256xf32> to vector<8x256xf32>
    %7 = arith.mulf %4, %6 : vector<8x256xf32>
    %cst = arith.constant dense<0.000000e+00> : vector<8xf32>
    %8 = vector.multi_reduction <add>, %7, %cst [1] : vector<8x256xf32> to vector<8xf32>
    %9 = vector.shape_cast %8 : vector<8xf32> to vector<8x1xf32>
    %10 = arith.addf %3, %9 : vector<8x1xf32>
    %c0_6 = arith.constant 0 : index
    %c0_7 = arith.constant 0 : index
    %11 = vector.load %arg6[%c0_6, %c0_7] : memref<8x1xf32, #tpu.memory_space<vmem>>, vector<8x1xf32>
    tpu.vector_store %arg6[%c0_6, %c0_7], %10 {strides = array<i32>} : memref<8x1xf32, #tpu.memory_space<vmem>>, vector<8x1xf32>,
    %c0_i32_8 = arith.constant 0 : i32
    %12 = arith.cmpi eq, %arg0, %c0_i32_8 : i32
    %13 = arith.extui %12 : i1 to i32
    %c0_i32_9 = arith.constant 0 : i32
    %14 = arith.cmpi ne, %13, %c0_i32_9 : i32
    scf.if %14 {
      %c0_10 = arith.constant 0 : index
      %c0_11 = arith.constant 0 : index
      %15 = vector.load %arg3[%c0_10, %c0_11] : memref<8x1xf32, #tpu.memory_space<vmem>>, vector<8x1xf32>
      %c0_12 = arith.constant 0 : index
      %c0_13 = arith.constant 0 : index
      %16 = vector.load %arg6[%c0_12, %c0_13] : memref<8x1xf32, #tpu.memory_space<vmem>>, vector<8x1xf32>
      %17 = arith.mulf %15, %16 : vector<8x1xf32>
      %c0_14 = arith.constant 0 : index
      %c0_15 = arith.constant 0 : index
      %18 = vector.load %arg4[%c0_14, %c0_15] : memref<1x1xf32, #tpu.memory_space<vmem>>, vector<1x1xf32>
      %19 = vector.broadcast %18 : vector<1x1xf32> to vector<8x1xf32>
      %20 = arith.addf %17, %19 : vector<8x1xf32>
      %c0_16 = arith.constant 0 : index
      %c0_17 = arith.constant 0 : index
      %21 = vector.load %arg5[%c0_16, %c0_17] : memref<8x1xf32, #tpu.memory_space<vmem>>, vector<8x1xf32>
      tpu.vector_store %arg5[%c0_16, %c0_17], %20 {strides = array<i32>} : memref<8x1xf32, #tpu.memory_space<vmem>>, vector<8x1xf32>,
    } else {
    }
    return
  }
  func.func @transform_0(%arg0: i32) -> (i32, i32) {
    %c0_i32 = arith.constant 0 : i32
    %c0_i32_0 = arith.constant 0 : i32
    return %c0_i32, %arg0 : i32, i32
  }
  func.func @transform_1(%arg0: i32) -> (i32, i32) {
    %c0_i32 = arith.constant 0 : i32
    %c0_i32_0 = arith.constant 0 : i32
    return %c0_i32, %arg0 : i32, i32
  }
  func.func @transform_2(%arg0: i32) -> (i32, i32) {
    %c0_i32 = arith.constant 0 : i32
    %c0_i32_0 = arith.constant 0 : i32
    %c0_i32_1 = arith.constant 0 : i32
    return %c0_i32, %c0_i32_0 : i32, i32
  }
  func.func @transform_3(%arg0: i32) -> (i32, i32) {
    %c0_i32 = arith.constant 0 : i32
    %c0_i32_0 = arith.constant 0 : i32
    %c0_i32_1 = arith.constant 0 : i32
    return %c0_i32, %c0_i32_0 : i32, i32
  }
  func.func @transform_4(%arg0: i32) -> (i32, i32) {
    %c0_i32 = arith.constant 0 : i32
    %c0_i32_0 = arith.constant 0 : i32
    %c0_i32_1 = arith.constant 0 : i32
    return %c0_i32, %c0_i32_0 : i32, i32
  }
}

</mosaic_0001>

<bundles_post_ra>
// kernel: gene_expression_gnn_forward.3
= control target key start
LH: loop header
LB: loop body
LE: loop exit
PB: predicated region body
PF: predicated region fallthrough
CT: control target
= control target key end

     0   :  { %v30_v0 = vlaneseq  ;;  %vm23_vm0 = vcmask 7168   ;;  %v69_v2 = vmov 0.0   ;;  %s116_s1 = inlined_call_operand.vmem [shape: f32[1,256], index: 1, kind: input, shape index: {}]   ;;  %s117_s3 = inlined_call_operand.<no memory space> [shape: f32[1,1], index: 3, kind: input, shape index: {}]   ;;  %s118_s0 = inlined_call_operand.vmem [shape: f32[8,256], index: 0, kind: input, shape index: {}]   ;;  %s119_s2 = inlined_call_operand.vmem [shape: f32[8,1], index: 2, kind: input, shape index: {}]   ;;  %s120_s4 = inlined_call_operand.vmem [shape: f32[8,1], index: 4, kind: output, shape index: {}]  }
   0x1   :  { %v9_v1 = vstv %s117_s3  ;;  %24 = vst.msk [vmem:[#allocation2] sm:$0xff] %vm23_vm0, %v69_v2  ;;  %v28_v4 = vld [vmem:[%s116_s1] sm:$0x3]  ;;  %v27_v8 = vld [vmem:[%s118_s0 + $0x8] sm:$0xff] }
   0x2   :  { %v31_v3 = vshrl.u32 %v30_v0, 7  ;;  %10 = vst [vmem:[#allocation3] sm:$0x1] %v9_v1  ;;  %v26_v7 = vld [vmem:[%s118_s0] sm:$0xff] }
   0x3   :  { %v51_v17 = vld [vmem:[%s119_s2] sm:$0xff] }
   0x4   :  { %v32_v5 = vsub.s32 0, %v31_v3  ;;  %v36_v6 = vsub.s32 1, %v31_v3 }
   0x6   :  { %v33_v9 = vrot.slane %v28_v4, %v32_v5  ;;  %v37_v10 = vrot.slane %v28_v4, %v36_v6 }
   0x8   :  { %v40_v11 = vmul.f32 %v33_v9, %v26_v7  ;;  %v41_v12 = vmul.f32 %v37_v10, %v27_v8  ;;  %v25_v14 = vld [vmem:[#allocation2] sm:$0xff] }
   0x9   :  { %v67_v19 = vld [vmem:[#allocation3] ss:$0 sm:$0xff] }
   0xa   :  { %v42_v13 = vadd.f32 %v41_v12, %v40_v11 }
   0xc   :  { %43 = vadd.xlane.f32.xlu0 %v42_v13 }
  0x95   :  { %v44_v15 = vpop.xlane.xlu0 %43 }
  0x96   :  { %v45_v16 = vadd.f32 %v44_v15, %v25_v14 }
  0x98   :  { %47 = vst.msk [vmem:[#allocation2] sm:$0xff] %vm23_vm0, %v45_v16 }
  0x9f   :  { %v52_v18 = vld [vmem:[#allocation2] sm:$0xff] }
  0xa0   :  { %v53_v20 = vmul.f32 %v52_v18, %v51_v17 }
  0xa2   :  { %v61_v21 = vadd.f32 %v67_v19, %v53_v20 }
  0xa4   :  { %62 = vst.msk [vmem:[%s120_s4] sm:$0xff] %vm23_vm0, %v61_v21 }

// kernel: gene_expression_gnn_forward.2
= control target key start
LH: loop header
LB: loop body
LE: loop exit
PB: predicated region body
PF: predicated region fallthrough
CT: control target
= control target key end

     0   :  { %v1377_v1 = vmov 0   ;;  %vm1136_vm0 = vcmask 7168   ;;  %s1964_s1 = inlined_call_operand.vmem [shape: bf16[256,128], index: 1, kind: input, shape index: {}]   ;;  %s1965_s2 = inlined_call_operand.vmem [shape: f32[256,1], index: 2, kind: input, shape index: {}]   ;;  %s1966_s0 = inlined_call_operand.vmem [shape: s8[256,256], index: 0, kind: input, shape index: {}]   ;;  %s1967_s3 = inlined_call_operand.vmem [shape: f32[1,128], index: 3, kind: input, shape index: {}]   ;;  %s1968_s4 = inlined_call_operand.vmem [shape: f32[1,128], index: 4, kind: input, shape index: {}]   ;;  %s1969_s5 = inlined_call_operand.vmem [shape: f32[256,1], index: 5, kind: output, shape index: {}]  }
   0x1   :  { %v1356_v0 = vld [vmem:[%s1964_s1 + $0x78] sm:$0xff]   ;;  %1355 = vset.pattern.permute.xlu1 %v1377_v1  ;;  %1354 = vset.pattern.permute.xlu0 %v1377_v1  ;;  %v1358_v3 = vld [vmem:[%s1964_s1 + $0x70] sm:$0xff]   ;;  %v1360_v5 = vld [vmem:[%s1964_s1 + $0x68] sm:$0xff]  }
   0x2   :  { %v1357_v2 = vld [vmem:[%s1964_s1 + $0x38] sm:$0xff]   ;;  %1225 = vmatprep.subr.bf16.mxu0 %v1356_v0  ;;  %1337 = vmatprep.subr.bf16.mxu1 %v1356_v0  ;;  %v1359_v4 = vld [vmem:[%s1964_s1 + $0x30] sm:$0xff]   ;;  %v1361_v6 = vld [vmem:[%s1964_s1 + $0x28] sm:$0xff]  }
   0x3   :  { %1226 = vmatpush3.bf16.msra.mxu0 %v1357_v2  ;;  %1345 = vmatpush3.bf16.msra.mxu1 %v1357_v2  ;;  %v1362_v7 = vld [vmem:[%s1964_s1 + $0x60] sm:$0xff]   ;;  %v676_v8 = vld [vmem:[%s1965_s2 + $0x10] sm:$0xff]  ;;  %v677_v10 = vld [vmem:[%s1965_s2 + $0x18] sm:$0xff] }
   0x4   :  { %1227 = vmatprep.subr.bf16.mxu0 %v1358_v3  ;;  %1338 = vmatprep.subr.bf16.mxu1 %v1358_v3  ;;  %v1363_v9 = vld [vmem:[%s1964_s1 + $0x20] sm:$0xff]   ;;  %v1364_v12 = vld [vmem:[%s1964_s1 + $0x58] sm:$0xff]   ;;  %v1453_v14 = vld [vmem:[%s1965_s2 + $0x8] sm:$0xff] }
   0x5   :  { %750 = vperm.xlu1 %1355, %v676_v8   ;;  %v1441_v11 = vld [vmem:[%s1965_s2] sm:$0xff]  ;;  %v1365_v13 = vld [vmem:[%s1964_s1 + $0x18] sm:$0xff]   ;;  %v679_v15 = vld [vmem:[%s1965_s2 + $0x28] sm:$0xff] }
   0x6   :  { %740 = vperm.xlu0 %1354, %v1441_v11   ;;  %v1366_v16 = vld [vmem:[%s1964_s1 + $0x50] sm:$0xff]   ;;  %v1465_v17 = vld [vmem:[%s1965_s2 + $0x20] sm:$0xff]  ;;  %v681_v21 = vld [vmem:[%s1965_s2 + $0x38] sm:$0xff] }
   0x7   :  { %1228 = vmatpush3.bf16.msra.mxu0 %v1359_v4  ;;  %1346 = vmatpush3.bf16.msra.mxu1 %v1359_v4  ;;  %v58_v18 = vld [vmem:[%s1966_s0] sm:$0xff]   ;;  %v1367_v20 = vld [vmem:[%s1964_s1 + $0x10] sm:$0xff]   ;;  %v1368_v26 = vld [vmem:[%s1964_s1 + $0x48] sm:$0xff]  }
   0x8   :  { %1229 = vmatprep.subr.bf16.mxu0 %v1360_v5  ;;  %1339 = vmatprep.subr.bf16.mxu1 %v1360_v5  ;;  %v74_v19 = vld [vmem:[%s1966_s0 + $0x40] sm:$0xff]   ;;  %v90_v22 = vunpack.c.l.s8.bf16 %v58_v18  ;;  %v91_v23 = vunpack.c.h.s8.bf16 %v58_v18  ;;  %v1369_v29 = vld [vmem:[%s1964_s1 + $0x8] sm:$0xff]   ;;  %v1492_v31 = vld [vmem:[%s1965_s2 + $0x30] sm:$0xff] }
   0x9   :  { %755 = vperm.xlu1 %1355, %v677_v10   ;;  %v106_v24 = vunpack.c.l.s8.bf16 %v74_v19  ;;  %v107_v25 = vunpack.c.h.s8.bf16 %v74_v19  ;;  %v683_v30 = vld [vmem:[%s1965_s2 + $0x48] sm:$0xff]  ;;  %v1370_v32 = vld [vmem:[%s1964_s1 + $0x40] sm:$0xff]   ;;  %v1510_v36 = vld [vmem:[%s1965_s2 + $0x58] sm:$0xff] }
   0xa   :  { %745 = vperm.xlu0 %1354, %v1453_v14   ;;  %v1176_v27 = vcombine.high %v90_v22, %v91_v23  ;;  %v60_v33 = vld [vmem:[%s1966_s0 + $0x8] sm:$0xff]   ;;  %v1371_v35 = vld [vmem:[%s1964_s1] sm:$0xff]   ;;  %v1175_v42 = vcombine.low %v90_v22, %v91_v23  ;;  %v62_v46 = vld [vmem:[%s1966_s0 + $0x10] sm:$0xff]  }
   0xb   :  { %1230 = vmatpush3.bf16.msra.mxu0 %v1361_v6  ;;  %1347 = vmatpush3.bf16.msra.mxu1 %v1361_v6  ;;  %v1192_v28 = vcombine.high %v106_v24, %v107_v25  ;;  %v76_v34 = vld [vmem:[%s1966_s0 + $0x48] sm:$0xff]   ;;  %v1515_v37 = vld [vmem:[%s1965_s2 + $0x40] sm:$0xff]  ;;  %v92_v38 = vunpack.c.l.s8.bf16 %v60_v33  ;;  %v93_v39 = vunpack.c.h.s8.bf16 %v60_v33  ;;  %v1191_v43 = vcombine.low %v106_v24, %v107_v25  ;;  %v78_v47 = vld [vmem:[%s1966_s0 + $0x50] sm:$0xff]  }
   0xc   :  { %1231 = vmatprep.subr.bf16.mxu0 %v1362_v7  ;;  %1340 = vmatprep.subr.bf16.mxu1 %v1362_v7  ;;  %v108_v40 = vunpack.c.l.s8.bf16 %v76_v34  ;;  %v109_v41 = vunpack.c.h.s8.bf16 %v76_v34  ;;  %v1528_v48 = vld [vmem:[%s1965_s2 + $0x68] sm:$0xff]  ;;  %v1533_v49 = vld [vmem:[%s1965_s2 + $0x50] sm:$0xff]  ;;  %v94_v50 = vunpack.c.l.s8.bf16 %v62_v46  ;;  %v95_v51 = vunpack.c.h.s8.bf16 %v62_v46  ;;  %v1540_v54 = vld [vmem:[%s1965_s2 + $0x78] sm:$0xff] }
   0xd   :  { %765 = vperm.xlu1 %1355, %v679_v15   ;;  %478 = vmatprep.mubr.bf16.mxu0 %v1176_v27  ;;  %v1178_v44 = vcombine.high %v92_v38, %v93_v39  ;;  %v110_v52 = vunpack.c.l.s8.bf16 %v78_v47  ;;  %v111_v53 = vunpack.c.h.s8.bf16 %v78_v47  ;;  %1973 = vst [vmem:[#allocation3_spill] sm:$0xff] %v1540_v54  ;;  %v1545_v55 = vld [vmem:[%s1965_s2 + $0x60] sm:$0xff]  ;;  %v1177_v56 = vcombine.low %v92_v38, %v93_v39  ;;  %v64_v60 = vld [vmem:[%s1966_s0 + $0x18] sm:$0xff]   ;;  %v1558_v62 = vld [vmem:[%s1965_s2 + $0x88] sm:$0xff] }
   0xe   :  { %760 = vperm.xlu0 %1354, %v1465_v17   ;;  %542 = vmatprep.mubr.bf16.mxu1 %v1192_v28  ;;  %v1194_v45 = vcombine.high %v108_v40, %v109_v41  ;;  %v1193_v57 = vcombine.low %v108_v40, %v109_v41  ;;  %v1180_v58 = vcombine.high %v94_v50, %v95_v51  ;;  %v80_v61 = vld [vmem:[%s1966_s0 + $0x58] sm:$0xff]   ;;  %v1563_v63 = vld [vmem:[%s1965_s2 + $0x70] sm:$0xff]  ;;  %v96_v0 = vunpack.c.l.s8.bf16 %v64_v60  ;;  %v1575_v5 = vld [vmem:[%s1965_s2 + $0x80] sm:$0xff] }
   0xf   :  { %1232 = vmatpush3.bf16.msra.mxu0 %v1363_v9  ;;  %1348 = vmatpush3.bf16.msra.mxu1 %v1363_v9  ;;  %v1196_v59 = vcombine.high %v110_v52, %v111_v53  ;;  %v97_v1 = vunpack.c.h.s8.bf16 %v64_v60  ;;  %v112_v2 = vunpack.c.l.s8.bf16 %v80_v61  ;;  %v113_v3 = vunpack.c.h.s8.bf16 %v80_v61  ;;  %v1570_v4 = vld [vmem:[%s1965_s2 + $0x98] sm:$0xff]  ;;  %v66_v10 = vld [vmem:[%s1966_s0 + $0x20] sm:$0xff]   ;;  %v1593_v15 = vld [vmem:[%s1965_s2 + $0x90] sm:$0xff] }
  0x10   :  { %1233 = vmatprep.subr.bf16.mxu0 %v1364_v12  ;;  %1341 = vmatprep.subr.bf16.mxu1 %v1364_v12  ;;  %v1179_v6 = vcombine.low %v94_v50, %v95_v51  ;;  %v1195_v7 = vcombine.low %v110_v52, %v111_v53  ;;  %v82_v12 = vld [vmem:[%s1966_s0 + $0x60] sm:$0xff]   ;;  %v99_v18 = vunpack.c.h.s8.bf16 %v66_v10  ;;  %v68_v27 = vld [vmem:[%s1966_s0 + $0x28] sm:$0xff]   ;;  %v1630_v38 = vld [vmem:[%s1965_s2 + $0xd8] sm:$0xff] }
  0x11   :  { %775 = vperm.xlu1 %1355, %v681_v21   ;;  %v1182_v8 = vcombine.high %v96_v0, %v97_v1  ;;  %v1198_v9 = vcombine.high %v112_v2, %v113_v3  ;;  %v114_v19 = vunpack.c.l.s8.bf16 %v82_v12  ;;  %v1600_v21 = vld [vmem:[%s1965_s2 + $0xb8] sm:$0xff]  ;;  %v1605_v22 = vld [vmem:[%s1965_s2 + $0xa0] sm:$0xff]  ;;  %v1181_v23 = vcombine.low %v96_v0, %v97_v1  ;;  %v84_v28 = vld [vmem:[%s1966_s0 + $0x68] sm:$0xff]  }
  0x12   :  { %770 = vperm.xlu0 %1354, %v1492_v31   ;;  %v1197_v24 = vcombine.low %v112_v2, %v113_v3  ;;  %v101_v33 = vunpack.c.h.s8.bf16 %v68_v27  ;;  %v116_v34 = vunpack.c.l.s8.bf16 %v84_v28  ;;  %v1635_v39 = vld [vmem:[%s1965_s2 + $0xc0] sm:$0xff]  ;;  %v1648_v46 = vld [vmem:[%s1965_s2 + $0xe8] sm:$0xff]  ;;  %v1653_v47 = vld [vmem:[%s1965_s2 + $0xd0] sm:$0xff] }
  0x13   :  { %1234 = vmatpush3.bf16.msra.mxu0 %v1365_v13  ;;  %1349 = vmatpush3.bf16.msra.mxu1 %v1365_v13  ;;  %v1588_v13 = vld [vmem:[%s1965_s2 + $0xa8] sm:$0xff]  ;;  %v72_v0 = vld [vmem:[%s1966_s0 + $0x38] sm:$0xff]   ;;  %v1678_v2 = vld [vmem:[%s1965_s2 + $0xf0] sm:$0xff] }
  0x14   :  { %1235 = vmatprep.subr.bf16.mxu0 %v1366_v16  ;;  %1342 = vmatprep.subr.bf16.mxu1 %v1366_v16  ;;  %v98_v16 = vunpack.c.l.s8.bf16 %v66_v10  ;;  %v88_v1 = vld [vmem:[%s1966_s0 + $0x78] sm:$0xff]   ;;  %1975 = vst [vmem:[#allocation5_spill] sm:$0xff] %v1678_v2  ;;  %v104_v3 = vunpack.c.l.s8.bf16 %v72_v0 }
  0x15   :  { %785 = vperm.xlu1 %1355, %v683_v30   ;;  %v1623_v30 = vld [vmem:[%s1965_s2 + $0xb0] sm:$0xff] }
  0x16   :  { %780 = vperm.xlu0 %1354, %v1515_v37   ;;  %v1184_v25 = vcombine.high %v98_v16, %v99_v18  ;;  %v1183_v40 = vcombine.low %v98_v16, %v99_v18 }
  0x17   :  { %1236 = vmatpush3.bf16.msra.mxu0 %v1367_v20  ;;  %1350 = vmatpush3.bf16.msra.mxu1 %v1367_v20  ;;  %v115_v20 = vunpack.c.h.s8.bf16 %v82_v12 }
  0x18   :  { %1237 = vmatprep.subr.bf16.mxu0 %v1368_v26  ;;  %1343 = vmatprep.subr.bf16.mxu1 %v1368_v26 }
  0x19   :  { %795 = vperm.xlu1 %1355, %v1510_v36   ;;  %v1200_v26 = vcombine.high %v114_v19, %v115_v20  ;;  %v1199_v41 = vcombine.low %v114_v19, %v115_v20 }
  0x1a   :  { %790 = vperm.xlu0 %1354, %v1533_v49  }
  0x1b   :  { %1238 = vmatpush3.bf16.msra.mxu0 %v1369_v29  ;;  %1351 = vmatpush3.bf16.msra.mxu1 %v1369_v29  ;;  %v1618_v29 = vld [vmem:[%s1965_s2 + $0xc8] sm:$0xff] }
  0x1c   :  { %1239 = vmatprep.subr.bf16.mxu0 %v1370_v32  ;;  %1344 = vmatprep.subr.bf16.mxu1 %v1370_v32  ;;  %v100_v32 = vunpack.c.l.s8.bf16 %v68_v27 }
  0x1d   :  { %805 = vperm.xlu1 %1355, %v1528_v48  }
  0x1e   :  { %800 = vperm.xlu0 %1354, %v1545_v55  }
  0x1f   :  { %1240 = vmatpush3.bf16.msra.mxu0 %v1371_v35  ;;  %1352 = vmatpush3.bf16.msra.mxu1 %v1371_v35  ;;  %v117_v35 = vunpack.c.h.s8.bf16 %v84_v28 }
  0x21   :  { %815 = vperm.xlu1 %1355, %v1540_v54  }
  0x22   :  { %479 = vmatmul.mubr.bf16.vlgmr.msra.gmra.mxu0 %v1175_v42  ;;  %543 = vmatmul.mubr.bf16.vlgmr.msra.gmra.mxu1 %v1191_v43  ;;  %v1186_v42 = vcombine.high %v100_v32, %v101_v33  ;;  %v1202_v43 = vcombine.high %v116_v34, %v117_v35 }
  0x23   :  { %486 = vmatprep.mubr.bf16.mxu0 %v1178_v44  ;;  %550 = vmatprep.mubr.bf16.mxu1 %v1194_v45  ;;  %v70_v44 = vld [vmem:[%s1966_s0 + $0x30] sm:$0xff]  }
  0x24   :  { %810 = vperm.xlu0 %1354, %v1563_v63   ;;  %v86_v45 = vld [vmem:[%s1966_s0 + $0x70] sm:$0xff]   ;;  %v102_v50 = vunpack.c.l.s8.bf16 %v70_v44  ;;  %v103_v51 = vunpack.c.h.s8.bf16 %v70_v44 }
  0x25   :  { %825 = vperm.xlu1 %1355, %v1558_v62   ;;  %v118_v52 = vunpack.c.l.s8.bf16 %v86_v45  ;;  %v119_v53 = vunpack.c.h.s8.bf16 %v86_v45 }
  0x26   :  { %v1188_v60 = vcombine.high %v102_v50, %v103_v51 }
  0x27   :  { %v1204_v61 = vcombine.high %v118_v52, %v119_v53  ;;  %v1203_v10 = vcombine.low %v118_v52, %v119_v53 }
  0x28   :  { %820 = vperm.xlu0 %1354, %v1575_v5  }
  0x29   :  { %835 = vperm.xlu1 %1355, %v1570_v4  }
  0x2a   :  { %487 = vmatmul.mubr.bf16.gmra.mxu0 %v1177_v56  ;;  %551 = vmatmul.mubr.bf16.gmra.mxu1 %v1193_v57  ;;  %v1660_v56 = vld [vmem:[%s1965_s2 + $0xf8] sm:$0xff]  ;;  %v1665_v57 = vld [vmem:[%s1965_s2 + $0xe0] sm:$0xff] }
  0x2b   :  { %494 = vmatprep.mubr.bf16.mxu0 %v1180_v58  ;;  %558 = vmatprep.mubr.bf16.mxu1 %v1196_v59  ;;  %1974 = vst [vmem:[#allocation4_spill] sm:$0xff] %v1660_v56  ;;  %v1185_v58 = vcombine.low %v100_v32, %v101_v33  ;;  %v1201_v59 = vcombine.low %v116_v34, %v117_v35 }
  0x2c   :  { %830 = vperm.xlu0 %1354, %v1593_v15  }
  0x2d   :  { %845 = vperm.xlu1 %1355, %v1588_v13  }
  0x30   :  { %840 = vperm.xlu0 %1354, %v1605_v22  }
  0x31   :  { %855 = vperm.xlu1 %1355, %v1600_v21  }
  0x32   :  { %495 = vmatmul.mubr.bf16.gmra.mxu0 %v1179_v6  ;;  %559 = vmatmul.mubr.bf16.gmra.mxu1 %v1195_v7  ;;  %v105_v6 = vunpack.c.h.s8.bf16 %v72_v0  ;;  %v120_v7 = vunpack.c.l.s8.bf16 %v88_v1  ;;  %v1710_v0 = vld [vmem:[%s1967_s3] ss:$0 sm:$0xff] }
  0x33   :  { %502 = vmatprep.mubr.bf16.mxu0 %v1182_v8  ;;  %566 = vmatprep.mubr.bf16.mxu1 %v1198_v9  ;;  %v121_v8 = vunpack.c.h.s8.bf16 %v88_v1  ;;  %v1187_v9 = vcombine.low %v102_v50, %v103_v51 }
  0x34   :  { %850 = vperm.xlu0 %1354, %v1623_v30   ;;  %v1190_v12 = vcombine.high %v104_v3, %v105_v6  ;;  %v1189_v18 = vcombine.low %v104_v3, %v105_v6 }
  0x35   :  { %865 = vperm.xlu1 %1355, %v1618_v29   ;;  %v1206_v16 = vcombine.high %v120_v7, %v121_v8  ;;  %v1205_v19 = vcombine.low %v120_v7, %v121_v8 }
  0x38   :  { %860 = vperm.xlu0 %1354, %v1635_v39  }
  0x39   :  { %875 = vperm.xlu1 %1355, %v1630_v38  }
  0x3a   :  { %503 = vmatmul.mubr.bf16.gmra.mxu0 %v1181_v23  ;;  %567 = vmatmul.mubr.bf16.gmra.mxu1 %v1197_v24 }
  0x3b   :  { %510 = vmatprep.mubr.bf16.mxu0 %v1184_v25  ;;  %574 = vmatprep.mubr.bf16.mxu1 %v1200_v26 }
  0x3c   :  { %870 = vperm.xlu0 %1354, %v1653_v47  }
  0x3d   :  { %885 = vperm.xlu1 %1355, %v1648_v46  }
  0x40   :  { %880 = vperm.xlu0 %1354, %v1665_v57  }
  0x41   :  { %895 = vperm.xlu1 %1355, %v1660_v56  }
  0x42   :  { %511 = vmatmul.mubr.bf16.gmra.mxu0 %v1183_v40  ;;  %575 = vmatmul.mubr.bf16.gmra.mxu1 %v1199_v41 }
  0x43   :  { %518 = vmatprep.mubr.bf16.mxu0 %v1186_v42  ;;  %582 = vmatprep.mubr.bf16.mxu1 %v1202_v43 }
  0x44   :  { %890 = vperm.xlu0 %1354, %v1678_v2  }
  0x4a   :  { %519 = vmatmul.mubr.bf16.gmra.mxu0 %v1185_v58  ;;  %583 = vmatmul.mubr.bf16.gmra.mxu1 %v1201_v59 }
  0x4b   :  { %526 = vmatprep.mubr.bf16.mxu0 %v1188_v60  ;;  %590 = vmatprep.mubr.bf16.mxu1 %v1204_v61 }
  0x52   :  { %527 = vmatmul.mubr.bf16.gmra.mxu0 %v1187_v9  ;;  %591 = vmatmul.mubr.bf16.gmra.mxu1 %v1203_v10 }
  0x53   :  { %534 = vmatprep.mubr.bf16.mxu0 %v1190_v12  ;;  %598 = vmatprep.mubr.bf16.mxu1 %v1206_v16 }
  0x5a   :  { %535 = vmatmul.mubr.bf16.gmra.mxu0 %v1189_v18  ;;  %599 = vmatmul.mubr.bf16.gmra.mxu1 %v1205_v19 }
  0x80   :  { %v751_v23 = vpop.permute.xlu1 %750 }
  0x81   :  { %v741_v20 = vpop.permute.xlu0 %740 }
  0x84   :  { %v1681_v25 = vpop.permute.xlu1 %755 }
  0x85   :  { %v746_v24 = vpop.permute.xlu0 %745 }
  0x88   :  { %v1685_v27 = vpop.permute.xlu1 %765 }
  0x89   :  { %v1683_v26 = vpop.permute.xlu0 %760 }
  0x8c   :  { %v1689_v32 = vpop.permute.xlu1 %775 }
  0x8d   :  { %v1687_v28 = vpop.permute.xlu0 %770 }
  0x90   :  { %v1693_v34 = vpop.permute.xlu1 %785 }
  0x91   :  { %v1691_v33 = vpop.permute.xlu0 %780 }
  0x94   :  { %v1697_v40 = vpop.permute.xlu1 %795 }
  0x95   :  { %v1695_v35 = vpop.permute.xlu0 %790 }
  0x98   :  { %v1701_v42 = vpop.permute.xlu1 %805 }
  0x99   :  { %v1699_v41 = vpop.permute.xlu0 %800 }
  0x9c   :  { %v1705_v50 = vpop.permute.xlu1 %815 }
  0x9f   :  { %v1703_v43 = vpop.permute.xlu0 %810 }
  0xa0   :  { %v826_v8 = vpop.permute.xlu1 %825 }
  0xa3   :  { %v821_v53 = vpop.permute.xlu0 %820 }
  0xe2   :  { %v1241_v44 = vpop.f32.mrf.mxu0  ;;  %v1289_v45 = vpop.f32.mrf.mxu1 }
  0xe4   :  { %v1242_v51 = vpop.f32.mrf.mxu0  ;;  %v1290_v52 = vpop.f32.mrf.mxu1 }
  0xe5   :  { %v1243_v58 = vadd.f32 %v1242_v51, %v1241_v44  ;;  %v1291_v59 = vadd.f32 %v1290_v52, %v1289_v45  ;;  %v1717_v44 = vld [vmem:[%s1968_s4] ss:$0 sm:$0xff] }
  0xe6   :  { %v1244_v60 = vpop.f32.mrf.mxu0  ;;  %v1292_v61 = vpop.f32.mrf.mxu1 }
  0xe7   :  { %v898_v1 = vmul.f32 %v1243_v58, %v741_v20  ;;  %v914_v3 = vmul.f32 %v1291_v59, %v821_v53  ;;  %v831_v59 = vpop.permute.xlu0 %830 }
  0xe8   :  { %v1245_v6 = vpop.f32.mrf.mxu0  ;;  %v1293_v7 = vpop.f32.mrf.mxu1 }
  0xe9   :  { %v1246_v9 = vadd.f32 %v1245_v6, %v1244_v60  ;;  %v1294_v10 = vadd.f32 %v1293_v7, %v1292_v61  ;;  %v953_v12 = vadd.f32 %v1710_v0, %v914_v3  ;;  %v937_v16 = vadd.f32 %v1710_v0, %v898_v1 }
  0xea   :  { %v1247_v18 = vpop.f32.mrf.mxu0  ;;  %v1295_v19 = vpop.f32.mrf.mxu1 }
  0xeb   :  { %v899_v45 = vmul.f32 %v1246_v9, %v746_v24  ;;  %v915_v51 = vmul.f32 %v1294_v10, %v826_v8  ;;  %v985_v20 = vmax.f32 %v953_v12, 0.0  ;;  %v969_v52 = vmax.f32 %v937_v16, 0.0  ;;  %v836_v16 = vpop.permute.xlu1 %835 }
  0xec   :  { %v1248_v53 = vpop.f32.mrf.mxu0  ;;  %v1296_v58 = vpop.f32.mrf.mxu1 }
  0xed   :  { %v1249_v60 = vadd.f32 %v1248_v53, %v1247_v18  ;;  %v1297_v61 = vadd.f32 %v1296_v58, %v1295_v19  ;;  %v1024_v3 = vmul.f32 %v1717_v44, %v985_v20  ;;  %v1008_v1 = vmul.f32 %v1717_v44, %v969_v52 }
  0xee   :  { %v1250_v6 = vpop.f32.mrf.mxu0  ;;  %v1298_v7 = vpop.f32.mrf.mxu1  ;;  %v938_v56 = vadd.f32 %v1710_v0, %v899_v45  ;;  %v954_v54 = vadd.f32 %v1710_v0, %v915_v51 }
  0xef   :  { %v900_v2 = vmul.f32 %v1249_v60, %v751_v23  ;;  %v916_v24 = vmul.f32 %v1297_v61, %v831_v59  ;;  %1072 = vadd.xlane.f32.xlu1 %v1024_v3  ;;  %1040 = vadd.xlane.f32.xlu0 %v1008_v1  ;;  %v841_v3 = vpop.permute.xlu0 %840 }
  0xf0   :  { %v1251_v8 = vpop.f32.mrf.mxu0  ;;  %v1299_v9 = vpop.f32.mrf.mxu1  ;;  %v970_v10 = vmax.f32 %v938_v56, 0.0  ;;  %v986_v12 = vmax.f32 %v954_v54, 0.0 }
  0xf1   :  { %v1252_v18 = vadd.f32 %v1251_v8, %v1250_v6  ;;  %v1300_v19 = vadd.f32 %v1299_v9, %v1298_v7  ;;  %v955_v20 = vadd.f32 %v1710_v0, %v916_v24  ;;  %v939_v52 = vadd.f32 %v1710_v0, %v900_v2 }
  0xf2   :  { %v1253_v53 = vpop.f32.mrf.mxu0  ;;  %v1301_v58 = vpop.f32.mrf.mxu1  ;;  %v1009_v45 = vmul.f32 %v1717_v44, %v970_v10  ;;  %v1025_v23 = vmul.f32 %v1717_v44, %v986_v12 }
  0xf3   :  { %v901_v51 = vmul.f32 %v1252_v18, %v1681_v25  ;;  %v917_v59 = vmul.f32 %v1300_v19, %v836_v16  ;;  %v987_v60 = vmax.f32 %v955_v20, 0.0  ;;  %v971_v61 = vmax.f32 %v939_v52, 0.0  ;;  %v846_v20 = vpop.permute.xlu1 %845 }
  0xf4   :  { %1042 = vadd.xlane.f32.xlu1 %v1009_v45  ;;  %1074 = vadd.xlane.f32.xlu0 %v1025_v23  ;;  %v1254_v54 = vpop.f32.mrf.mxu0  ;;  %v1302_v56 = vpop.f32.mrf.mxu1 }
  0xf5   :  { %v1255_v1 = vadd.f32 %v1254_v54, %v1253_v53  ;;  %v1303_v6 = vadd.f32 %v1302_v56, %v1301_v58  ;;  %v1026_v2 = vmul.f32 %v1717_v44, %v987_v60  ;;  %v1010_v7 = vmul.f32 %v1717_v44, %v971_v61 }
  0xf6   :  { %v1256_v24 = vpop.f32.mrf.mxu0  ;;  %v1304_v8 = vpop.f32.mrf.mxu1  ;;  %v940_v9 = vadd.f32 %v1710_v0, %v901_v51  ;;  %v956_v25 = vadd.f32 %v1710_v0, %v917_v59 }
  0xf7   :  { %v902_v10 = vmul.f32 %v1255_v1, %v1683_v26  ;;  %v918_v12 = vmul.f32 %v1303_v6, %v841_v3  ;;  %v851_v6 = vpop.permute.xlu0 %850 }
  0xf8   :  { %1076 = vadd.xlane.f32.xlu1 %v1026_v2  ;;  %1044 = vadd.xlane.f32.xlu0 %v1010_v7  ;;  %v1257_v16 = vpop.f32.mrf.mxu0  ;;  %v1305_v18 = vpop.f32.mrf.mxu1  ;;  %v972_v19 = vmax.f32 %v940_v9, 0.0  ;;  %v988_v59 = vmax.f32 %v956_v25, 0.0 }
  0xf9   :  { %v1258_v52 = vadd.f32 %v1257_v16, %v1256_v24  ;;  %v1306_v53 = vadd.f32 %v1305_v18, %v1304_v8  ;;  %v941_v58 = vadd.f32 %v1710_v0, %v902_v10  ;;  %v957_v45 = vadd.f32 %v1710_v0, %v918_v12 }
  0xfa   :  { %v1259_v23 = vpop.f32.mrf.mxu0  ;;  %v1307_v60 = vpop.f32.mrf.mxu1  ;;  %v1011_v51 = vmul.f32 %v1717_v44, %v972_v19  ;;  %v1027_v10 = vmul.f32 %v1717_v44, %v988_v59 }
  0xfb   :  { %v903_v26 = vmul.f32 %v1258_v52, %v1685_v27  ;;  %v919_v61 = vmul.f32 %v1306_v53, %v846_v20  ;;  %v973_v54 = vmax.f32 %v941_v58, 0.0  ;;  %v989_v1 = vmax.f32 %v957_v45, 0.0  ;;  %v856_v53 = vpop.permute.xlu1 %855 }
  0xfc   :  { %1046 = vadd.xlane.f32.xlu0 %v1011_v51  ;;  %v1260_v56 = vpop.f32.mrf.mxu0  ;;  %v1308_v3 = vpop.f32.mrf.mxu1 }
  0xfd   :  { %v1261_v2 = vadd.f32 %v1260_v56, %v1259_v23  ;;  %v1309_v7 = vadd.f32 %v1308_v3, %v1307_v60  ;;  %v1012_v24 = vmul.f32 %v1717_v44, %v973_v54  ;;  %v942_v12 = vadd.f32 %v1710_v0, %v903_v26 }
  0xfe   :  { %v1262_v8 = vpop.f32.mrf.mxu0  ;;  %v1310_v9 = vpop.f32.mrf.mxu1  ;;  %v958_v25 = vadd.f32 %v1710_v0, %v919_v61  ;;  %v1028_v20 = vmul.f32 %v1717_v44, %v989_v1 }
  0xff   :  { %v904_v27 = vmul.f32 %v1261_v2, %v1687_v28  ;;  %v920_v16 = vmul.f32 %v1309_v7, %v851_v6  ;;  %1048 = vadd.xlane.f32.xlu1 %v1012_v24  ;;  %v974_v52 = vmax.f32 %v942_v12, 0.0  ;;  %v861_v2 = vpop.permute.xlu0 %860 }
 0x100   :  { %1078 = vadd.xlane.f32.xlu0 %v1027_v10  ;;  %v1263_v18 = vpop.f32.mrf.mxu0  ;;  %v1311_v19 = vpop.f32.mrf.mxu1  ;;  %v990_v28 = vmax.f32 %v958_v25, 0.0 }
 0x101   :  { %v1264_v58 = vadd.f32 %v1263_v18, %v1262_v8  ;;  %v1312_v45 = vadd.f32 %v1311_v19, %v1310_v9  ;;  %v943_v23 = vadd.f32 %v1710_v0, %v904_v27  ;;  %v959_v60 = vadd.f32 %v1710_v0, %v920_v16 }
 0x102   :  { %v1265_v51 = vpop.f32.mrf.mxu0  ;;  %v1313_v59 = vpop.f32.mrf.mxu1  ;;  %v1013_v26 = vmul.f32 %v1717_v44, %v974_v52  ;;  %v1029_v12 = vmul.f32 %v1717_v44, %v990_v28 }
 0x103   :  { %v905_v61 = vmul.f32 %v1264_v58, %v1689_v32  ;;  %v921_v54 = vmul.f32 %v1312_v45, %v856_v53  ;;  %1080 = vadd.xlane.f32.xlu1 %v1028_v20  ;;  %v975_v56 = vmax.f32 %v943_v23, 0.0  ;;  %v991_v6 = vmax.f32 %v959_v60, 0.0  ;;  %v866_v53 = vpop.permute.xlu1 %865 }
 0x104   :  { %1050 = vadd.xlane.f32.xlu0 %v1013_v26  ;;  %v1266_v3 = vpop.f32.mrf.mxu0  ;;  %v1314_v1 = vpop.f32.mrf.mxu1 }
 0x105   :  { %v1267_v7 = vadd.f32 %v1266_v3, %v1265_v51  ;;  %v1315_v24 = vadd.f32 %v1314_v1, %v1313_v59  ;;  %v1014_v8 = vmul.f32 %v1717_v44, %v975_v56  ;;  %v944_v25 = vadd.f32 %v1710_v0, %v905_v61 }
 0x106   :  { %v1268_v9 = vpop.f32.mrf.mxu0  ;;  %v1316_v10 = vpop.f32.mrf.mxu1  ;;  %v960_v32 = vadd.f32 %v1710_v0, %v921_v54  ;;  %v1030_v20 = vmul.f32 %v1717_v44, %v991_v6 }
 0x107   :  { %v906_v27 = vmul.f32 %v1267_v7, %v1691_v33  ;;  %v922_v16 = vmul.f32 %v1315_v24, %v861_v2  ;;  %1052 = vadd.xlane.f32.xlu1 %v1014_v8  ;;  %v976_v52 = vmax.f32 %v944_v25, 0.0  ;;  %v871_v6 = vpop.permute.xlu0 %870 }
 0x108   :  { %1082 = vadd.xlane.f32.xlu0 %v1029_v12  ;;  %v1269_v18 = vpop.f32.mrf.mxu0  ;;  %v1317_v19 = vpop.f32.mrf.mxu1  ;;  %v992_v33 = vmax.f32 %v960_v32, 0.0 }
 0x109   :  { %v1270_v58 = vadd.f32 %v1269_v18, %v1268_v9  ;;  %v1318_v45 = vadd.f32 %v1317_v19, %v1316_v10  ;;  %v945_v23 = vadd.f32 %v1710_v0, %v906_v27  ;;  %v961_v60 = vadd.f32 %v1710_v0, %v922_v16 }
 0x10a   :  { %v1271_v51 = vpop.f32.mrf.mxu0  ;;  %v1319_v59 = vpop.f32.mrf.mxu1  ;;  %v1015_v26 = vmul.f32 %v1717_v44, %v976_v52  ;;  %v1031_v10 = vmul.f32 %v1717_v44, %v992_v33 }
 0x10b   :  { %v907_v28 = vmul.f32 %v1270_v58, %v1693_v34  ;;  %v923_v61 = vmul.f32 %v1318_v45, %v866_v53  ;;  %1084 = vadd.xlane.f32.xlu1 %v1030_v20  ;;  %v977_v54 = vmax.f32 %v945_v23, 0.0  ;;  %v993_v1 = vmax.f32 %v961_v60, 0.0  ;;  %v876_v20 = vpop.permute.xlu1 %875 }
 0x10c   :  { %1054 = vadd.xlane.f32.xlu0 %v1015_v26  ;;  %v1272_v56 = vpop.f32.mrf.mxu0  ;;  %v1320_v3 = vpop.f32.mrf.mxu1 }
 0x10d   :  { %v1273_v2 = vadd.f32 %v1272_v56, %v1271_v51  ;;  %v1321_v7 = vadd.f32 %v1320_v3, %v1319_v59  ;;  %v1016_v24 = vmul.f32 %v1717_v44, %v977_v54  ;;  %v946_v12 = vadd.f32 %v1710_v0, %v907_v28  ;;  %v881_v56 = vpop.permute.xlu0 %880 }
 0x10e   :  { %v1274_v8 = vpop.f32.mrf.mxu0  ;;  %v1322_v9 = vpop.f32.mrf.mxu1  ;;  %v962_v34 = vadd.f32 %v1710_v0, %v923_v61  ;;  %v1032_v18 = vmul.f32 %v1717_v44, %v993_v1 }
 0x10f   :  { %v908_v25 = vmul.f32 %v1273_v2, %v1695_v35  ;;  %v924_v32 = vmul.f32 %v1321_v7, %v871_v6  ;;  %1056 = vadd.xlane.f32.xlu1 %v1016_v24  ;;  %v978_v19 = vmax.f32 %v946_v12, 0.0 }
 0x110   :  { %1086 = vadd.xlane.f32.xlu0 %v1031_v10  ;;  %v1275_v27 = vpop.f32.mrf.mxu0  ;;  %v1323_v16 = vpop.f32.mrf.mxu1  ;;  %v994_v35 = vmax.f32 %v962_v34, 0.0 }
 0x111   :  { %v1276_v52 = vadd.f32 %v1275_v27, %v1274_v8  ;;  %v1324_v53 = vadd.f32 %v1323_v16, %v1322_v9  ;;  %v947_v58 = vadd.f32 %v1710_v0, %v908_v25  ;;  %v963_v45 = vadd.f32 %v1710_v0, %v924_v32  ;;  %v886_v27 = vpop.permute.xlu1 %885 }
 0x112   :  { %v1277_v23 = vpop.f32.mrf.mxu0  ;;  %v1325_v60 = vpop.f32.mrf.mxu1  ;;  %v1017_v51 = vmul.f32 %v1717_v44, %v978_v19  ;;  %v1033_v24 = vmul.f32 %v1717_v44, %v994_v35 }
 0x113   :  { %v909_v59 = vmul.f32 %v1276_v52, %v1697_v40  ;;  %v925_v26 = vmul.f32 %v1324_v53, %v876_v20  ;;  %1088 = vadd.xlane.f32.xlu1 %v1032_v18  ;;  %v979_v33 = vmax.f32 %v947_v58, 0.0  ;;  %v995_v54 = vmax.f32 %v963_v45, 0.0 }
 0x114   :  { %1058 = vadd.xlane.f32.xlu0 %v1017_v51  ;;  %v1278_v28 = vpop.f32.mrf.mxu0  ;;  %v1326_v61 = vpop.f32.mrf.mxu1 }
 0x115   :  { %v1279_v3 = vadd.f32 %v1278_v28, %v1277_v23  ;;  %v1327_v1 = vadd.f32 %v1326_v61, %v1325_v60  ;;  %v1018_v6 = vmul.f32 %v1717_v44, %v979_v33  ;;  %v948_v8 = vadd.f32 %v1710_v0, %v909_v59 }
 0x116   :  { %v1280_v2 = vpop.f32.mrf.mxu0  ;;  %v1328_v7 = vpop.f32.mrf.mxu1  ;;  %v964_v40 = vadd.f32 %v1710_v0, %v925_v26  ;;  %v1034_v25 = vmul.f32 %v1717_v44, %v995_v54 }
 0x117   :  { %v910_v9 = vmul.f32 %v1279_v3, %v1699_v41  ;;  %v926_v10 = vmul.f32 %v1327_v1, %v881_v56  ;;  %1060 = vadd.xlane.f32.xlu1 %v1018_v6  ;;  %v980_v32 = vmax.f32 %v948_v8, 0.0  ;;  %v891_v26 = vpop.permute.xlu0 %890 }
 0x118   :  { %1090 = vadd.xlane.f32.xlu0 %v1033_v24  ;;  %v1281_v12 = vpop.f32.mrf.mxu0  ;;  %v1329_v34 = vpop.f32.mrf.mxu1  ;;  %v996_v41 = vmax.f32 %v964_v40, 0.0 }
 0x119   :  { %v1282_v16 = vadd.f32 %v1281_v12, %v1280_v2  ;;  %v1330_v18 = vadd.f32 %v1329_v34, %v1328_v7  ;;  %v949_v19 = vadd.f32 %v1710_v0, %v910_v9  ;;  %v965_v20 = vadd.f32 %v1710_v0, %v926_v10 }
 0x11a   :  { %v1283_v52 = vpop.f32.mrf.mxu0  ;;  %v1331_v53 = vpop.f32.mrf.mxu1  ;;  %v1019_v58 = vmul.f32 %v1717_v44, %v980_v32  ;;  %v1035_v3 = vmul.f32 %v1717_v44, %v996_v41 }
 0x11b   :  { %v911_v45 = vmul.f32 %v1282_v16, %v1701_v42  ;;  %v927_v23 = vmul.f32 %v1330_v18, %v886_v27  ;;  %1092 = vadd.xlane.f32.xlu1 %v1034_v25  ;;  %v981_v60 = vmax.f32 %v949_v19, 0.0  ;;  %v997_v59 = vmax.f32 %v965_v20, 0.0  ;;  %v896_v25 = vpop.permute.xlu1 %895 }
 0x11c   :  { %1062 = vadd.xlane.f32.xlu0 %v1019_v58  ;;  %v1284_v51 = vpop.f32.mrf.mxu0  ;;  %v1332_v35 = vpop.f32.mrf.mxu1 }
 0x11d   :  { %v1285_v33 = vadd.f32 %v1284_v51, %v1283_v52  ;;  %v1333_v28 = vadd.f32 %v1332_v35, %v1331_v53  ;;  %v1020_v61 = vmul.f32 %v1717_v44, %v981_v60  ;;  %v950_v1 = vadd.f32 %v1710_v0, %v911_v45 }
 0x11e   :  { %v1286_v54 = vpop.f32.mrf.mxu0  ;;  %v1334_v56 = vpop.f32.mrf.mxu1  ;;  %v966_v42 = vadd.f32 %v1710_v0, %v927_v23  ;;  %v1036_v8 = vmul.f32 %v1717_v44, %v997_v59 }
 0x11f   :  { %v912_v6 = vmul.f32 %v1285_v33, %v1703_v43  ;;  %v928_v2 = vmul.f32 %v1333_v28, %v891_v26  ;;  %1064 = vadd.xlane.f32.xlu1 %v1020_v61  ;;  %v982_v40 = vmax.f32 %v950_v1, 0.0 }
 0x120   :  { %1094 = vadd.xlane.f32.xlu0 %v1035_v3  ;;  %v1287_v7 = vpop.f32.mrf.mxu0  ;;  %v1335_v24 = vpop.f32.mrf.mxu1  ;;  %v998_v27 = vmax.f32 %v966_v42, 0.0 }
 0x121   :  { %v1288_v9 = vadd.f32 %v1287_v7, %v1286_v54  ;;  %v1336_v10 = vadd.f32 %v1335_v24, %v1334_v56  ;;  %v951_v12 = vadd.f32 %v1710_v0, %v912_v6  ;;  %v967_v34 = vadd.f32 %v1710_v0, %v928_v2 }
 0x122   :  { %v1021_v32 = vmul.f32 %v1717_v44, %v982_v40  ;;  %v1037_v58 = vmul.f32 %v1717_v44, %v998_v27 }
 0x123   :  { %v913_v43 = vmul.f32 %v1288_v9, %v1705_v50  ;;  %v929_v16 = vmul.f32 %v1336_v10, %v896_v25  ;;  %1096 = vadd.xlane.f32.xlu1 %v1036_v8  ;;  %v983_v18 = vmax.f32 %v951_v12, 0.0  ;;  %v999_v20 = vmax.f32 %v967_v34, 0.0 }
 0x124   :  { %1066 = vadd.xlane.f32.xlu0 %v1021_v32 }
 0x125   :  { %v1022_v19 = vmul.f32 %v1717_v44, %v983_v18  ;;  %v952_v52 = vadd.f32 %v1710_v0, %v913_v43  ;;  %v968_v53 = vadd.f32 %v1710_v0, %v929_v16  ;;  %v1038_v23 = vmul.f32 %v1717_v44, %v999_v20 }
 0x127   :  { %1068 = vadd.xlane.f32.xlu1 %v1022_v19  ;;  %v984_v41 = vmax.f32 %v952_v52, 0.0  ;;  %v1000_v45 = vmax.f32 %v968_v53, 0.0 }
 0x128   :  { %1098 = vadd.xlane.f32.xlu0 %v1037_v58 }
 0x129   :  { %v1023_v50 = vmul.f32 %v1717_v44, %v984_v41  ;;  %v1039_v60 = vmul.f32 %v1717_v44, %v1000_v45 }
 0x12b   :  { %1100 = vadd.xlane.f32.xlu1 %v1038_v23 }
 0x12c   :  { %1070 = vadd.xlane.f32.xlu0 %v1023_v50 }
 0x130   :  { %1102 = vadd.xlane.f32.xlu0 %v1039_v60 }
 0x178   :  { %v1073_v51 = vpop.xlane.xlu1 %1072  ;;  %v1041_v35 = vpop.xlane.xlu0 %1040 }
 0x179   :  { %v1120_v0 = vmul.f32 %v1073_v51, %v1575_v5  ;;  %v1104_v59 = vmul.f32 %v1041_v35, %v1441_v11 }
 0x17b   :  { %1153 = vst.msk [vmem:[%s1969_s5 + $0x80] sm:$0xff] %vm1136_vm0, %v1120_v0  ;;  %1137 = vst.msk [vmem:[%s1969_s5] sm:$0xff] %vm1136_vm0, %v1104_v59 }
 0x17d   :  { %v1043_v44 = vpop.xlane.xlu1 %1042  ;;  %v1075_v26 = vpop.xlane.xlu0 %1074 }
 0x17e   :  { %v1105_v33 = vmul.f32 %v1043_v44, %v1453_v14  ;;  %v1121_v28 = vmul.f32 %v1075_v26, %v1558_v62  ;;  %v1372_v14 = vld [vmem:[%s1965_s2 + $0x10] sm:$0xff]  ;;  %v1977_v26 = vld [vmem:[#allocation3_spill] sm:$0xff] }
 0x180   :  { %1138 = vst.msk [vmem:[%s1969_s5 + $0x8] sm:$0xff] %vm1136_vm0, %v1105_v33  ;;  %1154 = vst.msk [vmem:[%s1969_s5 + $0x88] sm:$0xff] %vm1136_vm0, %v1121_v28 }
 0x181   :  { %v1077_v11 = vpop.xlane.xlu1 %1076  ;;  %v1045_v5 = vpop.xlane.xlu0 %1044 }
 0x182   :  { %v1122_v61 = vmul.f32 %v1077_v11, %v1593_v15  ;;  %v1106_v54 = vmul.f32 %v1372_v14, %v1045_v5  ;;  %v1373_v15 = vld [vmem:[%s1965_s2 + $0x18] sm:$0xff] }
 0x184   :  { %1155 = vst.msk [vmem:[%s1969_s5 + $0x90] sm:$0xff] %vm1136_vm0, %v1122_v61  ;;  %1139 = vst.msk [vmem:[%s1969_s5 + $0x10] sm:$0xff] %vm1136_vm0, %v1106_v54 }
 0x185   :  { %v1047_v62 = vpop.xlane.xlu0 %1046 }
 0x186   :  { %v1107_v56 = vmul.f32 %v1373_v15, %v1047_v62 }
 0x188   :  { %1140 = vst.msk [vmem:[%s1969_s5 + $0x18] sm:$0xff] %vm1136_vm0, %v1107_v56  ;;  %v1049_v3 = vpop.xlane.xlu1 %1048 }
 0x189   :  { %v1108_v1 = vmul.f32 %v1049_v3, %v1465_v17  ;;  %v1079_v42 = vpop.xlane.xlu0 %1078  ;;  %v1374_v17 = vld [vmem:[%s1965_s2 + $0x28] sm:$0xff] }
 0x18a   :  { %v1123_v6 = vmul.f32 %v1079_v42, %v1570_v4 }
 0x18b   :  { %1141 = vst.msk [vmem:[%s1969_s5 + $0x20] sm:$0xff] %vm1136_vm0, %v1108_v1 }
 0x18c   :  { %1156 = vst.msk [vmem:[%s1969_s5 + $0x98] sm:$0xff] %vm1136_vm0, %v1123_v6  ;;  %v1081_v2 = vpop.xlane.xlu1 %1080 }
 0x18d   :  { %v1124_v7 = vmul.f32 %v1081_v2, %v1605_v22  ;;  %v1051_v24 = vpop.xlane.xlu0 %1050 }
 0x18e   :  { %v1109_v8 = vmul.f32 %v1374_v17, %v1051_v24 }
 0x18f   :  { %1157 = vst.msk [vmem:[%s1969_s5 + $0xa0] sm:$0xff] %vm1136_vm0, %v1124_v7 }
 0x190   :  { %1142 = vst.msk [vmem:[%s1969_s5 + $0x28] sm:$0xff] %vm1136_vm0, %v1109_v8  ;;  %v1053_v4 = vpop.xlane.xlu1 %1052 }
 0x191   :  { %v1110_v40 = vmul.f32 %v1053_v4, %v1492_v31  ;;  %v1083_v22 = vpop.xlane.xlu0 %1082  ;;  %v1375_v31 = vld [vmem:[%s1965_s2 + $0x38] sm:$0xff] }
 0x192   :  { %v1125_v9 = vmul.f32 %v1083_v22, %v1588_v13 }
 0x193   :  { %1143 = vst.msk [vmem:[%s1969_s5 + $0x30] sm:$0xff] %vm1136_vm0, %v1110_v40 }
 0x194   :  { %1158 = vst.msk [vmem:[%s1969_s5 + $0xa8] sm:$0xff] %vm1136_vm0, %v1125_v9  ;;  %v1085_v10 = vpop.xlane.xlu1 %1084 }
 0x195   :  { %v1126_v12 = vmul.f32 %v1085_v10, %v1623_v30  ;;  %v1055_v34 = vpop.xlane.xlu0 %1054 }
 0x196   :  { %v1111_v25 = vmul.f32 %v1375_v31, %v1055_v34 }
 0x197   :  { %1159 = vst.msk [vmem:[%s1969_s5 + $0xb0] sm:$0xff] %vm1136_vm0, %v1126_v12 }
 0x198   :  { %1144 = vst.msk [vmem:[%s1969_s5 + $0x38] sm:$0xff] %vm1136_vm0, %v1111_v25  ;;  %v1057_v13 = vpop.xlane.xlu1 %1056 }
 0x199   :  { %v1112_v32 = vmul.f32 %v1057_v13, %v1515_v37  ;;  %v1087_v30 = vpop.xlane.xlu0 %1086  ;;  %v1376_v37 = vld [vmem:[%s1965_s2 + $0x48] sm:$0xff] }
 0x19a   :  { %v1127_v27 = vmul.f32 %v1087_v30, %v1600_v21 }
 0x19b   :  { %1145 = vst.msk [vmem:[%s1969_s5 + $0x40] sm:$0xff] %vm1136_vm0, %v1112_v32 }
 0x19c   :  { %1160 = vst.msk [vmem:[%s1969_s5 + $0xb8] sm:$0xff] %vm1136_vm0, %v1127_v27  ;;  %v1089_v43 = vpop.xlane.xlu1 %1088 }
 0x19d   :  { %v1128_v16 = vmul.f32 %v1089_v43, %v1635_v39  ;;  %v1059_v18 = vpop.xlane.xlu0 %1058 }
 0x19e   :  { %v1113_v19 = vmul.f32 %v1376_v37, %v1059_v18 }
 0x19f   :  { %1161 = vst.msk [vmem:[%s1969_s5 + $0xc0] sm:$0xff] %vm1136_vm0, %v1128_v16 }
 0x1a0   :  { %1146 = vst.msk [vmem:[%s1969_s5 + $0x48] sm:$0xff] %vm1136_vm0, %v1113_v19  ;;  %v1061_v21 = vpop.xlane.xlu1 %1060 }
 0x1a1   :  { %v1114_v20 = vmul.f32 %v1061_v21, %v1533_v49  ;;  %v1091_v39 = vpop.xlane.xlu0 %1090 }
 0x1a2   :  { %v1129_v52 = vmul.f32 %v1091_v39, %v1618_v29 }
 0x1a3   :  { %1147 = vst.msk [vmem:[%s1969_s5 + $0x50] sm:$0xff] %vm1136_vm0, %v1114_v20 }
 0x1a4   :  { %1162 = vst.msk [vmem:[%s1969_s5 + $0xc8] sm:$0xff] %vm1136_vm0, %v1129_v52  ;;  %v1093_v53 = vpop.xlane.xlu1 %1092 }
 0x1a5   :  { %v1130_v58 = vmul.f32 %v1093_v53, %v1653_v47  ;;  %v1063_v41 = vpop.xlane.xlu0 %1062 }
 0x1a6   :  { %v1115_v45 = vmul.f32 %v1063_v41, %v1510_v36 }
 0x1a7   :  { %1163 = vst.msk [vmem:[%s1969_s5 + $0xd0] sm:$0xff] %vm1136_vm0, %v1130_v58 }
 0x1a8   :  { %1148 = vst.msk [vmem:[%s1969_s5 + $0x58] sm:$0xff] %vm1136_vm0, %v1115_v45  ;;  %v1065_v49 = vpop.xlane.xlu1 %1064 }
 0x1a9   :  { %v1116_v29 = vmul.f32 %v1065_v49, %v1545_v55  ;;  %v1095_v23 = vpop.xlane.xlu0 %1094 }
 0x1aa   :  { %v1131_v50 = vmul.f32 %v1095_v23, %v1630_v38 }
 0x1ab   :  { %1149 = vst.msk [vmem:[%s1969_s5 + $0x60] sm:$0xff] %vm1136_vm0, %v1116_v29 }
 0x1ac   :  { %1164 = vst.msk [vmem:[%s1969_s5 + $0xd8] sm:$0xff] %vm1136_vm0, %v1131_v50  ;;  %v1097_v36 = vpop.xlane.xlu1 %1096 }
 0x1ad   :  { %v1132_v47 = vmul.f32 %v1097_v36, %v1665_v57  ;;  %v1067_v60 = vpop.xlane.xlu0 %1066  ;;  %v1976_v57 = vld [vmem:[#allocation5_spill] sm:$0xff] }
 0x1ae   :  { %v1117_v51 = vmul.f32 %v1067_v60, %v1528_v48 }
 0x1af   :  { %1165 = vst.msk [vmem:[%s1969_s5 + $0xe0] sm:$0xff] %vm1136_vm0, %v1132_v47 }
 0x1b0   :  { %1150 = vst.msk [vmem:[%s1969_s5 + $0x68] sm:$0xff] %vm1136_vm0, %v1117_v51  ;;  %v1069_v55 = vpop.xlane.xlu1 %1068 }
 0x1b1   :  { %v1118_v38 = vmul.f32 %v1069_v55, %v1563_v63  ;;  %v1099_v35 = vpop.xlane.xlu0 %1098 }
 0x1b2   :  { %v1133_v0 = vmul.f32 %v1099_v35, %v1648_v46  ;;  %v1978_v46 = vld [vmem:[#allocation4_spill] sm:$0xff] }
 0x1b3   :  { %1151 = vst.msk [vmem:[%s1969_s5 + $0x70] sm:$0xff] %vm1136_vm0, %v1118_v38 }
 0x1b4   :  { %1166 = vst.msk [vmem:[%s1969_s5 + $0xe8] sm:$0xff] %vm1136_vm0, %v1133_v0  ;;  %v1101_v48 = vpop.xlane.xlu1 %1100 }
 0x1b5   :  { %v1134_v59 = vmul.f32 %v1101_v48, %v1976_v57  ;;  %v1071_v44 = vpop.xlane.xlu0 %1070 }
 0x1b6   :  { %v1119_v33 = vmul.f32 %v1071_v44, %v1977_v26 }
 0x1b7   :  { %1167 = vst.msk [vmem:[%s1969_s5 + $0xf0] sm:$0xff] %vm1136_vm0, %v1134_v59 }
 0x1b8   :  { %1152 = vst.msk [vmem:[%s1969_s5 + $0x78] sm:$0xff] %vm1136_vm0, %v1119_v33 }
 0x1b9   :  { %v1103_v63 = vpop.xlane.xlu0 %1102 }
 0x1ba   :  { %v1135_v28 = vmul.f32 %v1103_v63, %v1978_v46 }
 0x1bc   :  { %1168 = vst.msk [vmem:[%s1969_s5 + $0xf8] sm:$0xff] %vm1136_vm0, %v1135_v28 }

</bundles_post_ra>
